<compile_context>
chip_gen: v7x
topology: tpu7x:2x2x1
jax: 0.10.0
libtpu: 0.0.40
codegen_flags: <defaults>
</compile_context>

<pallas_src>
import functools

import jax
import jax.numpy as jnp
from jax.experimental import pallas as pl
from jax.experimental.pallas import tpu as pltpu

LN_EPS = 1e-12   # TowerEncoder signature default: eps=1e-12.


# ----------------------------------- kernel -----------------------------------

def _tower_kernel(num_blocks, eps, inv_d, *refs):
    """Fused tower forward for one row tile.

    refs (num_blocks > 0): x, w_in, b_in, w_blk, v_blk, w_out, b_out, o
    refs (num_blocks == 0): x, w_in, b_in, w_out, b_out, o
    """
    if num_blocks > 0:
        x_ref, w_in, b_in, w_blk, v_blk, w_out, b_out, o_ref = refs
    else:
        x_ref, w_in, b_in, w_out, b_out, o_ref = refs

    # Per-tile f32 -> bf16 cast (VPU, hidden under the MXU); no wrapper-side copy.
    x = x_ref[...].astype(w_in.dtype)
    h = jnp.dot(x, w_in[...], preferred_element_type=jnp.float32) + b_in[...]

    # Tower blocks: LayerNorm(Dropout(ReLU(Linear(h))) + h), dropout p=0.
    for k in range(num_blocks):
        y = jnp.dot(h.astype(w_blk.dtype), w_blk[k],
                    preferred_element_type=jnp.float32)
        vecs = v_blk[k]                               # (3, H) f32: bias, gamma, beta
        y = jnp.maximum(y + vecs[0:1, :], 0.0)        # bias + ReLU
        # TODO(synk): in-kernel stochastic dropout (p>0, training) not implemented.
        z = y + h                                     # residual
        # One-pass LayerNorm statistics: the two XLU reductions issue back to
        # back (no full-tile subtract between them).  eps=1e-12 cannot absorb
        # f32 cancellation, so clamp var at 0.
        s1 = jnp.sum(z, axis=-1, keepdims=True)
        s2 = jnp.sum(z * z, axis=-1, keepdims=True)
        mean = s1 * inv_d
        var = jnp.maximum(s2 * inv_d - mean * mean, 0.0)
        h = (z - mean) * jax.lax.rsqrt(var + eps) * vecs[1:2, :] + vecs[2:3, :]

    # Output projector (lane-dense padded output, bf16 store).
    out = jnp.dot(h.astype(w_out.dtype), w_out[...],
                  preferred_element_type=jnp.float32) + b_out[...]
    o_ref[...] = out.astype(o_ref.dtype)


# ------------------------------ one-time prepack -------------------------------

def prepack_tower_params(params, *, compute_dtype=jnp.bfloat16):
    """One-time packing of TowerEncoder weights for the kernel.

    Stacks per-block weights into (nb, H, H) / (nb, 3, H), casts matmul weights
    to bf16 and zero-pads the output feature dim to a multiple of 128 so the
    final store is lane-dense.  Call once and reuse: no per-call weight copies.
    """
    hidden = int(params["w_in"].shape[1])
    d_out = int(params["w_out"].shape[1])
    d_out_p = int(pl.cdiv(d_out, 128) * 128)

    w_out = params["w_out"].astype(compute_dtype)
    b_out = params["b_out"].reshape(1, d_out).astype(jnp.float32)
    if d_out_p != d_out:
        w_out = jnp.pad(w_out, ((0, 0), (0, d_out_p - d_out)))
        b_out = jnp.pad(b_out, ((0, 0), (0, d_out_p - d_out)))

    packed = {
        "d_in": int(params["w_in"].shape[0]),
        "hidden": hidden,
        "d_out": d_out,
        "d_out_p": d_out_p,
        "num_blocks": len(params["blocks"]),
        "w_in": params["w_in"].astype(compute_dtype),
        "b_in": params["b_in"].reshape(1, hidden).astype(jnp.float32),
        "w_out": w_out,
        "b_out": b_out,
    }
    if packed["num_blocks"]:
        # TODO(synk): optional fp8 block-weight quantization on v7x (halves
        # resident VMEM); needs an accuracy check, so not enabled here.
        packed["w_blk"] = jnp.stack(
            [blk["w"] for blk in params["blocks"]]).astype(compute_dtype)
        packed["v_blk"] = jnp.stack(
            [jnp.stack([blk["b"], blk["gamma"], blk["beta"]])
             for blk in params["blocks"]]).astype(jnp.float32)      # (nb, 3, H)
    return jax.block_until_ready(packed)


# ---------------------------------- wrapper ------------------------------------

def tower_encoder_forward(x, packed, *, out_dtype=jnp.bfloat16, dropout_p=0.0):
    """x: (N, d_in) float32. Returns (N, d_out) in `out_dtype` (bf16 default)."""
    # Dropout is identity only for p == 0 (the module default).
    assert dropout_p == 0.0, "TODO(synk): in-kernel dropout (p>0) not implemented"

    N, d_in = x.shape
    assert d_in == packed["d_in"], "input feature dim mismatch with packed params"
    hidden, d_out, d_out_p = packed["hidden"], packed["d_out"], packed["d_out_p"]
    nb = packed["num_blocks"]

    inputs = [x, packed["w_in"], packed["b_in"]]
    if nb:
        inputs += [packed["w_blk"], packed["v_blk"]]
    inputs += [packed["w_out"], packed["b_out"]]
    param_bytes = sum(int(p.size) * p.dtype.itemsize for p in inputs[1:])

    # ---- generation-aware VMEM ceiling / row-tile target ----------------------
    try:
        vmem_cap = int(pltpu.get_tpu_info().vmem_capacity_bytes)
    except Exception:                                   # conservative default
        vmem_cap = 64 << 20
    small_vmem = vmem_cap <= (64 << 20)                 # v7x-class: 64 MiB / TC
    vmem_ceiling = (48 << 20) if small_vmem else (100 << 20)   # v5e/v6e: 128 MiB
    tm_target = 256 if small_vmem else 512

    out_itemsize = jnp.dtype(out_dtype).itemsize

    def vmem_need(tm, param_buffers):
        # x / out tiles are double-buffered by the pipeline; resident weights
        # are single-buffered (param_buffers == 1) unless the fallback is used.
        tile_bytes = tm * d_in * x.dtype.itemsize + tm * d_out_p * out_itemsize
        temp_bytes = tm * (4 * hidden + d_out_p) * 4 + tm * d_in * 2
        return param_buffers * param_bytes + 2 * tile_bytes + temp_bytes + (2 << 20)

    # Row tile: largest that fits, clamped to N (Pallas masks the ragged last
    # tile; x is never padded/copied in the wrapper).  On v7x keep >= 2 grid
    # steps per TensorCore when N allows.
    if N < 8:
        tm_eff = N                                      # block equals full array dim
    else:
        tm_eff = min(tm_target, (N // 8) * 8)
        if small_vmem and N >= 32:
            tm_eff = min(tm_eff, max(8, (N // 4) // 8 * 8))
    while tm_eff > 8 and vmem_need(tm_eff, 1) > vmem_ceiling:
        tm_eff = max(8, (tm_eff // 2) // 8 * 8)
    # TODO(synk): if resident block weights alone exceed the VMEM budget
    # (deep/wide tower on v7x), stream w_blk over an inner "arbitrary" grid axis.

    grid = (int(pl.cdiv(N, tm_eff)),)
    kernel = functools.partial(_tower_kernel, nb, LN_EPS, 1.0 / hidden)
    out_shape = jax.ShapeDtypeStruct((N, d_out_p), out_dtype)

    def build_and_run(single_buffer_params):
        def resident(p):
            zeros = (0,) * p.ndim
            idx = lambda i, _z=zeros: _z                # constant block index
            if single_buffer_params:
                return pl.BlockSpec(p.shape, idx, pipeline_mode=pl.Buffered(1))
            return pl.BlockSpec(p.shape, idx)

        in_specs = [pl.BlockSpec((tm_eff, d_in), lambda i: (i, 0))]
        in_specs += [resident(p) for p in inputs[1:]]
        out_spec = pl.BlockSpec((tm_eff, d_out_p), lambda i: (i, 0))

        nbuf = 1 if single_buffer_params else 2
        vmem_limit = int(min(vmem_ceiling, max(32 << 20, vmem_need(tm_eff, nbuf))))

        return pl.pallas_call(
            kernel,
            out_shape=out_shape,
            grid_spec=pltpu.PrefetchScalarGridSpec(
                num_scalar_prefetch=0,
                grid=grid,
                in_specs=in_specs,
                out_specs=out_spec,
            ),
            compiler_params=pltpu.CompilerParams(
                dimension_semantics=("parallel",),
                vmem_limit_bytes=vmem_limit,
            ),
        )(*inputs)

    try:
        out = build_and_run(True)        # resident weights single-buffered
    except Exception:
        out = build_and_run(False)       # fallback: default (double) buffering

    return out if d_out_p == d_out else out[:, :d_out]


# ----------------------- parameter init (deterministic) ------------------------

def _trunc_normal(key, shape, std=0.02):
    # Matches nn.init.trunc_normal_(std=0.02, a=-0.04, b=0.04).
    return std * jax.random.truncated_normal(key, -2.0, 2.0, shape, dtype=jnp.float32)


def init_tower_params(key, input_dim, hidden_dims, output_dim, initializer_range=0.02):
    keys = jax.random.split(key, 2 + len(hidden_dims))
    params = {
        "w_in": _trunc_normal(keys[0], (input_dim, hidden_dims[0]), initializer_range),
        "b_in": jnp.zeros((hidden_dims[0],), jnp.float32),
        "blocks": [],
        "w_out": _trunc_normal(keys[1], (hidden_dims[-1], output_dim), initializer_range),
        "b_out": jnp.zeros((output_dim,), jnp.float32),
    }
    for i in range(len(hidden_dims) - 1):
        d0, d1 = hidden_dims[i], hidden_dims[i + 1]
        assert d0 == d1, "residual in TowerBlock requires equal in/out dims"
        params["blocks"].append({
            "w": _trunc_normal(keys[2 + i], (d0, d1), initializer_range),
            "b": jnp.zeros((d1,), jnp.float32),
            "gamma": jnp.ones((d1,), jnp.float32),
            "beta": jnp.zeros((d1,), jnp.float32),
        })
    return params


# ------------------------------ pure-JAX reference ------------------------------

def tower_encoder_ref(x, params):
    h = x @ params["w_in"] + params["b_in"]
    for blk in params["blocks"]:
        y = jnp.maximum(h @ blk["w"] + blk["b"], 0.0)
        z = y + h
        mean = jnp.mean(z, axis=-1, keepdims=True)
        var = jnp.mean((z - mean) ** 2, axis=-1, keepdims=True)
        h = (z - mean) * jax.lax.rsqrt(var + LN_EPS) * blk["gamma"] + blk["beta"]
    return h @ params["w_out"] + params["b_out"]


if __name__ == "__main__":
    key = jax.random.PRNGKey(0)
    k_x, k_m, k_p = jax.random.split(key, 3)

    B, S = 2, 8
    input_dim = 16
    hidden_dims = [32, 32, 32]   # two TowerBlocks
    output_dim = 24

    x = jax.random.normal(k_x, (B, S, input_dim), dtype=jnp.float32)
    mask = jax.random.uniform(k_m, (B, S)) > 0.5      # TensorWithMask.mask

    params = init_tower_params(k_p, input_dim, hidden_dims, output_dim)
    packed = prepack_tower_params(params)             # one-time prepack, reused per call

    x_flat = x.reshape(B * S, input_dim)
    out_flat = tower_encoder_forward(x_flat, packed)
    embeddings = out_flat.reshape(B, S, output_dim)

    # TensorWithMask(embeddings, embeddings[mask]): dynamic-shape boolean gather,
    # performed in eager JAX outside the kernel.
    masked_embeddings = embeddings[mask]

    jax.block_until_ready((embeddings, masked_embeddings))

    ref = tower_encoder_ref(x_flat, params).reshape(B, S, output_dim)
    emb_f32 = embeddings.astype(jnp.float32)
    max_err = float(jnp.max(jnp.abs(emb_f32 - ref)))
    # bf16 MXU inputs / bf16 output with f32 accumulation -> relaxed tolerance.
    assert jnp.allclose(emb_f32, ref, atol=2e-2, rtol=2e-2), (
        f"mismatch vs reference (max abs err {max_err})")

    print("KERNEL_OK")
</pallas_src>

<mosaic_0001>
module attributes {stable_mosaic.version = 11 : i64} {
  func.func @_tower_kernel(%arg0: i32, %arg1: memref<16x16xf32, #tpu.memory_space<vmem>>, %arg2: memref<16x32xbf16, #tpu.memory_space<vmem>>, %arg3: memref<1x32xf32, #tpu.memory_space<vmem>>, %arg4: memref<2x32x32xbf16, #tpu.memory_space<vmem>>, %arg5: memref<2x3x32xf32, #tpu.memory_space<vmem>>, %arg6: memref<32x128xbf16, #tpu.memory_space<vmem>>, %arg7: memref<1x128xf32, #tpu.memory_space<vmem>>, %arg8: memref<16x128xbf16, #tpu.memory_space<vmem>>) attributes {dimension_semantics = [#tpu.dimension_semantics<parallel>], iteration_bounds = array<i64: 1>, scalar_prefetch = 0 : i64, scratch_operands = 0 : i64, tpu.core_type = #tpu.core_type<tc>, window_params = [{transform_indices = @transform_0, window_bounds = array<i64: 16, 16>}, {pipeline_mode = #tpu.pipeline_mode<synchronous>, transform_indices = @transform_1, window_bounds = array<i64: 16, 32>}, {pipeline_mode = #tpu.pipeline_mode<synchronous>, transform_indices = @transform_2, window_bounds = array<i64: 1, 32>}, {pipeline_mode = #tpu.pipeline_mode<synchronous>, transform_indices = @transform_3, window_bounds = array<i64: 2, 32, 32>}, {pipeline_mode = #tpu.pipeline_mode<synchronous>, transform_indices = @transform_4, window_bounds = array<i64: 2, 3, 32>}, {pipeline_mode = #tpu.pipeline_mode<synchronous>, transform_indices = @transform_5, window_bounds = array<i64: 32, 128>}, {pipeline_mode = #tpu.pipeline_mode<synchronous>, transform_indices = @transform_6, window_bounds = array<i64: 1, 128>}, {transform_indices = @transform_7, window_bounds = array<i64: 16, 128>}]} {
    %c0 = arith.constant 0 : index
    %c0_0 = arith.constant 0 : index
    %0 = vector.load %arg1[%c0, %c0_0] : memref<16x16xf32, #tpu.memory_space<vmem>>, vector<16x16xf32>
    %1 = arith.truncf %0 : vector<16x16xf32> to vector<16x16xbf16>
    %c0_1 = arith.constant 0 : index
    %c0_2 = arith.constant 0 : index
    %2 = vector.load %arg2[%c0_1, %c0_2] : memref<16x32xbf16, #tpu.memory_space<vmem>>, vector<16x32xbf16>
    %cst = arith.constant dense<0.000000e+00> : vector<16x32xf32>
    %3 = tpu.matmul %1, %2, %cst {dimension_numbers = #tpu.dot_dimension_numbers<[1], [0], [0], [1], [0, 0, 1, 1], [], []>} : vector<16x16xbf16>, vector<16x32xbf16>, vector<16x32xf32> -> vector<16x32xf32>
    %c0_3 = arith.constant 0 : index
    %c0_4 = arith.constant 0 : index
    %4 = vector.load %arg3[%c0_3, %c0_4] : memref<1x32xf32, #tpu.memory_space<vmem>>, vector<1x32xf32>
    %5 = vector.broadcast %4 : vector<1x32xf32> to vector<16x32xf32>
    %6 = arith.addf %3, %5 : vector<16x32xf32>
    %7 = arith.truncf %6 : vector<16x32xf32> to vector<16x32xbf16>
    %c0_5 = arith.constant 0 : index
    %c0_6 = arith.constant 0 : index
    %c0_7 = arith.constant 0 : index
    %8 = vector.load %arg4[%c0_5, %c0_6, %c0_7] : memref<2x32x32xbf16, #tpu.memory_space<vmem>>, vector<1x32x32xbf16>
    %9 = vector.shape_cast %8 : vector<1x32x32xbf16> to vector<32x32xbf16>
    %cst_8 = arith.constant dense<0.000000e+00> : vector<16x32xf32>
    %10 = tpu.matmul %7, %9, %cst_8 {dimension_numbers = #tpu.dot_dimension_numbers<[1], [0], [0], [1], [0, 0, 1, 1], [], []>} : vector<16x32xbf16>, vector<32x32xbf16>, vector<16x32xf32> -> vector<16x32xf32>
    %c0_9 = arith.constant 0 : index
    %c0_10 = arith.constant 0 : index
    %c0_11 = arith.constant 0 : index
    %11 = vector.load %arg5[%c0_9, %c0_10, %c0_11] : memref<2x3x32xf32, #tpu.memory_space<vmem>>, vector<1x3x32xf32>
    %12 = vector.shape_cast %11 : vector<1x3x32xf32> to vector<3x32xf32>
    %13 = vector.extract_strided_slice %12 {offsets = [0, 0], sizes = [1, 32], strides = [1, 1]} : vector<3x32xf32> to vector<1x32xf32>
    %14 = vector.broadcast %13 : vector<1x32xf32> to vector<16x32xf32>
    %15 = arith.addf %10, %14 : vector<16x32xf32>
    %cst_12 = arith.constant 0.000000e+00 : f32
    %16 = vector.broadcast %cst_12 : f32 to vector<16x32xf32>
    %17 = arith.maximumf %15, %16 : vector<16x32xf32>
    %18 = arith.addf %17, %6 : vector<16x32xf32>
    %cst_13 = arith.constant dense<0.000000e+00> : vector<16xf32>
    %19 = vector.multi_reduction <add>, %18, %cst_13 [1] : vector<16x32xf32> to vector<16xf32>
    %20 = vector.shape_cast %19 : vector<16xf32> to vector<16x1xf32>
    %21 = arith.mulf %18, %18 : vector<16x32xf32>
    %cst_14 = arith.constant dense<0.000000e+00> : vector<16xf32>
    %22 = vector.multi_reduction <add>, %21, %cst_14 [1] : vector<16x32xf32> to vector<16xf32>
    %23 = vector.shape_cast %22 : vector<16xf32> to vector<16x1xf32>
    %cst_15 = arith.constant 3.125000e-02 : f32
    %24 = vector.broadcast %cst_15 : f32 to vector<16x1xf32>
    %25 = arith.mulf %20, %24 : vector<16x1xf32>
    %cst_16 = arith.constant 3.125000e-02 : f32
    %26 = vector.broadcast %cst_16 : f32 to vector<16x1xf32>
    %27 = arith.mulf %23, %26 : vector<16x1xf32>
    %28 = arith.mulf %25, %25 : vector<16x1xf32>
    %29 = arith.subf %27, %28 : vector<16x1xf32>
    %cst_17 = arith.constant 0.000000e+00 : f32
    %30 = vector.broadcast %cst_17 : f32 to vector<16x1xf32>
    %31 = arith.maximumf %29, %30 : vector<16x1xf32>
    %32 = vector.broadcast %25 : vector<16x1xf32> to vector<16x32xf32>
    %33 = arith.subf %18, %32 : vector<16x32xf32>
    %cst_18 = arith.constant 9.99999996E-13 : f32
    %34 = vector.broadcast %cst_18 : f32 to vector<16x1xf32>
    %35 = arith.addf %31, %34 : vector<16x1xf32>
    %36 = math.rsqrt %35 : vector<16x1xf32>
    %37 = vector.broadcast %36 : vector<16x1xf32> to vector<16x32xf32>
    %38 = arith.mulf %33, %37 : vector<16x32xf32>
    %39 = vector.extract_strided_slice %12 {offsets = [1, 0], sizes = [1, 32], strides = [1, 1]} : vector<3x32xf32> to vector<1x32xf32>
    %40 = vector.broadcast %39 : vector<1x32xf32> to vector<16x32xf32>
    %41 = arith.mulf %38, %40 : vector<16x32xf32>
    %42 = vector.extract_strided_slice %12 {offsets = [2, 0], sizes = [1, 32], strides = [1, 1]} : vector<3x32xf32> to vector<1x32xf32>
    %43 = vector.broadcast %42 : vector<1x32xf32> to vector<16x32xf32>
    %44 = arith.addf %41, %43 : vector<16x32xf32>
    %45 = arith.truncf %44 : vector<16x32xf32> to vector<16x32xbf16>
    %c1 = arith.constant 1 : index
    %c0_19 = arith.constant 0 : index
    %c0_20 = arith.constant 0 : index
    %46 = vector.load %arg4[%c1, %c0_19, %c0_20] : memref<2x32x32xbf16, #tpu.memory_space<vmem>>, vector<1x32x32xbf16>
    %47 = vector.shape_cast %46 : vector<1x32x32xbf16> to vector<32x32xbf16>
    %cst_21 = arith.constant dense<0.000000e+00> : vector<16x32xf32>
    %48 = tpu.matmul %45, %47, %cst_21 {dimension_numbers = #tpu.dot_dimension_numbers<[1], [0], [0], [1], [0, 0, 1, 1], [], []>} : vector<16x32xbf16>, vector<32x32xbf16>, vector<16x32xf32> -> vector<16x32xf32>
    %c1_22 = arith.constant 1 : index
    %c0_23 = arith.constant 0 : index
    %c0_24 = arith.constant 0 : index
    %49 = vector.load %arg5[%c1_22, %c0_23, %c0_24] : memref<2x3x32xf32, #tpu.memory_space<vmem>>, vector<1x3x32xf32>
    %50 = vector.shape_cast %49 : vector<1x3x32xf32> to vector<3x32xf32>
    %51 = vector.extract_strided_slice %50 {offsets = [0, 0], sizes = [1, 32], strides = [1, 1]} : vector<3x32xf32> to vector<1x32xf32>
    %52 = vector.broadcast %51 : vector<1x32xf32> to vector<16x32xf32>
    %53 = arith.addf %48, %52 : vector<16x32xf32>
    %cst_25 = arith.constant 0.000000e+00 : f32
    %54 = vector.broadcast %cst_25 : f32 to vector<16x32xf32>
    %55 = arith.maximumf %53, %54 : vector<16x32xf32>
    %56 = arith.addf %55, %44 : vector<16x32xf32>
    %cst_26 = arith.constant dense<0.000000e+00> : vector<16xf32>
    %57 = vector.multi_reduction <add>, %56, %cst_26 [1] : vector<16x32xf32> to vector<16xf32>
    %58 = vector.shape_cast %57 : vector<16xf32> to vector<16x1xf32>
    %59 = arith.mulf %56, %56 : vector<16x32xf32>
    %cst_27 = arith.constant dense<0.000000e+00> : vector<16xf32>
    %60 = vector.multi_reduction <add>, %59, %cst_27 [1] : vector<16x32xf32> to vector<16xf32>
    %61 = vector.shape_cast %60 : vector<16xf32> to vector<16x1xf32>
    %cst_28 = arith.constant 3.125000e-02 : f32
    %62 = vector.broadcast %cst_28 : f32 to vector<16x1xf32>
    %63 = arith.mulf %58, %62 : vector<16x1xf32>
    %cst_29 = arith.constant 3.125000e-02 : f32
    %64 = vector.broadcast %cst_29 : f32 to vector<16x1xf32>
    %65 = arith.mulf %61, %64 : vector<16x1xf32>
    %66 = arith.mulf %63, %63 : vector<16x1xf32>
    %67 = arith.subf %65, %66 : vector<16x1xf32>
    %cst_30 = arith.constant 0.000000e+00 : f32
    %68 = vector.broadcast %cst_30 : f32 to vector<16x1xf32>
    %69 = arith.maximumf %67, %68 : vector<16x1xf32>
    %70 = vector.broadcast %63 : vector<16x1xf32> to vector<16x32xf32>
    %71 = arith.subf %56, %70 : vector<16x32xf32>
    %cst_31 = arith.constant 9.99999996E-13 : f32
    %72 = vector.broadcast %cst_31 : f32 to vector<16x1xf32>
    %73 = arith.addf %69, %72 : vector<16x1xf32>
    %74 = math.rsqrt %73 : vector<16x1xf32>
    %75 = vector.broadcast %74 : vector<16x1xf32> to vector<16x32xf32>
    %76 = arith.mulf %71, %75 : vector<16x32xf32>
    %77 = vector.extract_strided_slice %50 {offsets = [1, 0], sizes = [1, 32], strides = [1, 1]} : vector<3x32xf32> to vector<1x32xf32>
    %78 = vector.broadcast %77 : vector<1x32xf32> to vector<16x32xf32>
    %79 = arith.mulf %76, %78 : vector<16x32xf32>
    %80 = vector.extract_strided_slice %50 {offsets = [2, 0], sizes = [1, 32], strides = [1, 1]} : vector<3x32xf32> to vector<1x32xf32>
    %81 = vector.broadcast %80 : vector<1x32xf32> to vector<16x32xf32>
    %82 = arith.addf %79, %81 : vector<16x32xf32>
    %83 = arith.truncf %82 : vector<16x32xf32> to vector<16x32xbf16>
    %c0_32 = arith.constant 0 : index
    %c0_33 = arith.constant 0 : index
    %84 = vector.load %arg6[%c0_32, %c0_33] : memref<32x128xbf16, #tpu.memory_space<vmem>>, vector<32x128xbf16>
    %cst_34 = arith.constant dense<0.000000e+00> : vector<16x128xf32>
    %85 = tpu.matmul %83, %84, %cst_34 {dimension_numbers = #tpu.dot_dimension_numbers<[1], [0], [0], [1], [0, 0, 1, 1], [], []>} : vector<16x32xbf16>, vector<32x128xbf16>, vector<16x128xf32> -> vector<16x128xf32>
    %c0_35 = arith.constant 0 : index
    %c0_36 = arith.constant 0 : index
    %86 = vector.load %arg7[%c0_35, %c0_36] : memref<1x128xf32, #tpu.memory_space<vmem>>, vector<1x128xf32>
    %87 = vector.broadcast %86 : vector<1x128xf32> to vector<16x128xf32>
    %88 = arith.addf %85, %87 : vector<16x128xf32>
    %89 = arith.truncf %88 : vector<16x128xf32> to vector<16x128xbf16>
    %c0_37 = arith.constant 0 : index
    %c0_38 = arith.constant 0 : index
    %90 = vector.load %arg8[%c0_37, %c0_38] : memref<16x128xbf16, #tpu.memory_space<vmem>>, vector<16x128xbf16>
    tpu.vector_store %arg8[%c0_37, %c0_38], %89 {strides = array<i32>} : memref<16x128xbf16, #tpu.memory_space<vmem>>, vector<16x128xbf16>,
    return
  }
  func.func @transform_0(%arg0: i32) -> (i32, i32) {
    %c0_i32 = arith.constant 0 : i32
    %c0_i32_0 = arith.constant 0 : i32
    return %arg0, %c0_i32 : i32, i32
  }
  func.func @transform_1(%arg0: i32) -> (i32, i32) {
    %c0_i32 = arith.constant 0 : i32
    %c0_i32_0 = arith.constant 0 : i32
    %c0_i32_1 = arith.constant 0 : i32
    return %c0_i32, %c0_i32_0 : i32, i32
  }
  func.func @transform_2(%arg0: i32) -> (i32, i32) {
    %c0_i32 = arith.constant 0 : i32
    %c0_i32_0 = arith.constant 0 : i32
    %c0_i32_1 = arith.constant 0 : i32
    return %c0_i32, %c0_i32_0 : i32, i32
  }
  func.func @transform_3(%arg0: i32) -> (i32, i32, i32) {
    %c0_i32 = arith.constant 0 : i32
    %c0_i32_0 = arith.constant 0 : i32
    %c0_i32_1 = arith.constant 0 : i32
    %c0_i32_2 = arith.constant 0 : i32
    return %c0_i32, %c0_i32_0, %c0_i32_1 : i32, i32, i32
  }
  func.func @transform_4(%arg0: i32) -> (i32, i32, i32) {
    %c0_i32 = arith.constant 0 : i32
    %c0_i32_0 = arith.constant 0 : i32
    %c0_i32_1 = arith.constant 0 : i32
    %c0_i32_2 = arith.constant 0 : i32
    return %c0_i32, %c0_i32_0, %c0_i32_1 : i32, i32, i32
  }
  func.func @transform_5(%arg0: i32) -> (i32, i32) {
    %c0_i32 = arith.constant 0 : i32
    %c0_i32_0 = arith.constant 0 : i32
    %c0_i32_1 = arith.constant 0 : i32
    return %c0_i32, %c0_i32_0 : i32, i32
  }
  func.func @transform_6(%arg0: i32) -> (i32, i32) {
    %c0_i32 = arith.constant 0 : i32
    %c0_i32_0 = arith.constant 0 : i32
    %c0_i32_1 = arith.constant 0 : i32
    return %c0_i32, %c0_i32_0 : i32, i32
  }
  func.func @transform_7(%arg0: i32) -> (i32, i32) {
    %c0_i32 = arith.constant 0 : i32
    %c0_i32_0 = arith.constant 0 : i32
    return %arg0, %c0_i32 : i32, i32
  }
}

module attributes {stable_mosaic.version = 11 : i64} {
  func.func @_tower_kernel(%arg0: i32, %arg1: memref<16x16xf32, #tpu.memory_space<vmem>>, %arg2: memref<16x32xbf16, #tpu.memory_space<vmem>>, %arg3: memref<1x32xf32, #tpu.memory_space<vmem>>, %arg4: memref<2x32x32xbf16, #tpu.memory_space<vmem>>, %arg5: memref<2x3x32xf32, #tpu.memory_space<vmem>>, %arg6: memref<32x128xbf16, #tpu.memory_space<vmem>>, %arg7: memref<1x128xf32, #tpu.memory_space<vmem>>, %arg8: memref<16x128xbf16, #tpu.memory_space<vmem>>) attributes {dimension_semantics = [#tpu.dimension_semantics<parallel>], iteration_bounds = array<i64: 1>, scalar_prefetch = 0 : i64, scratch_operands = 0 : i64, tpu.core_type = #tpu.core_type<tc>, window_params = [{transform_indices = @transform_0, window_bounds = array<i64: 16, 16>}, {pipeline_mode = #tpu.pipeline_mode<synchronous>, transform_indices = @transform_1, window_bounds = array<i64: 16, 32>}, {pipeline_mode = #tpu.pipeline_mode<synchronous>, transform_indices = @transform_2, window_bounds = array<i64: 1, 32>}, {pipeline_mode = #tpu.pipeline_mode<synchronous>, transform_indices = @transform_3, window_bounds = array<i64: 2, 32, 32>}, {pipeline_mode = #tpu.pipeline_mode<synchronous>, transform_indices = @transform_4, window_bounds = array<i64: 2, 3, 32>}, {pipeline_mode = #tpu.pipeline_mode<synchronous>, transform_indices = @transform_5, window_bounds = array<i64: 32, 128>}, {pipeline_mode = #tpu.pipeline_mode<synchronous>, transform_indices = @transform_6, window_bounds = array<i64: 1, 128>}, {transform_indices = @transform_7, window_bounds = array<i64: 16, 128>}]} {
    %c0 = arith.constant 0 : index
    %c0_0 = arith.constant 0 : index
    %0 = vector.load %arg1[%c0, %c0_0] : memref<16x16xf32, #tpu.memory_space<vmem>>, vector<16x16xf32>
    %1 = arith.truncf %0 : vector<16x16xf32> to vector<16x16xbf16>
    %c0_1 = arith.constant 0 : index
    %c0_2 = arith.constant 0 : index
    %2 = vector.load %arg2[%c0_1, %c0_2] : memref<16x32xbf16, #tpu.memory_space<vmem>>, vector<16x32xbf16>
    %cst = arith.constant dense<0.000000e+00> : vector<16x32xf32>
    %3 = tpu.matmul %1, %2, %cst {dimension_numbers = #tpu.dot_dimension_numbers<[1], [0], [0], [1], [0, 0, 1, 1], [], []>} : vector<16x16xbf16>, vector<16x32xbf16>, vector<16x32xf32> -> vector<16x32xf32>
    %c0_3 = arith.constant 0 : index
    %c0_4 = arith.constant 0 : index
    %4 = vector.load %arg3[%c0_3, %c0_4] : memref<1x32xf32, #tpu.memory_space<vmem>>, vector<1x32xf32>
    %5 = vector.broadcast %4 : vector<1x32xf32> to vector<16x32xf32>
    %6 = arith.addf %3, %5 : vector<16x32xf32>
    %7 = arith.truncf %6 : vector<16x32xf32> to vector<16x32xbf16>
    %c0_5 = arith.constant 0 : index
    %c0_6 = arith.constant 0 : index
    %c0_7 = arith.constant 0 : index
    %8 = vector.load %arg4[%c0_5, %c0_6, %c0_7] : memref<2x32x32xbf16, #tpu.memory_space<vmem>>, vector<1x32x32xbf16>
    %9 = vector.shape_cast %8 : vector<1x32x32xbf16> to vector<32x32xbf16>
    %cst_8 = arith.constant dense<0.000000e+00> : vector<16x32xf32>
    %10 = tpu.matmul %7, %9, %cst_8 {dimension_numbers = #tpu.dot_dimension_numbers<[1], [0], [0], [1], [0, 0, 1, 1], [], []>} : vector<16x32xbf16>, vector<32x32xbf16>, vector<16x32xf32> -> vector<16x32xf32>
    %c0_9 = arith.constant 0 : index
    %c0_10 = arith.constant 0 : index
    %c0_11 = arith.constant 0 : index
    %11 = vector.load %arg5[%c0_9, %c0_10, %c0_11] : memref<2x3x32xf32, #tpu.memory_space<vmem>>, vector<1x3x32xf32>
    %12 = vector.shape_cast %11 : vector<1x3x32xf32> to vector<3x32xf32>
    %13 = vector.extract_strided_slice %12 {offsets = [0, 0], sizes = [1, 32], strides = [1, 1]} : vector<3x32xf32> to vector<1x32xf32>
    %14 = vector.broadcast %13 : vector<1x32xf32> to vector<16x32xf32>
    %15 = arith.addf %10, %14 : vector<16x32xf32>
    %cst_12 = arith.constant 0.000000e+00 : f32
    %16 = vector.broadcast %cst_12 : f32 to vector<16x32xf32>
    %17 = arith.maximumf %15, %16 : vector<16x32xf32>
    %18 = arith.addf %17, %6 : vector<16x32xf32>
    %cst_13 = arith.constant dense<0.000000e+00> : vector<16xf32>
    %19 = vector.multi_reduction <add>, %18, %cst_13 [1] : vector<16x32xf32> to vector<16xf32>
    %20 = vector.shape_cast %19 : vector<16xf32> to vector<16x1xf32>
    %21 = arith.mulf %18, %18 : vector<16x32xf32>
    %cst_14 = arith.constant dense<0.000000e+00> : vector<16xf32>
    %22 = vector.multi_reduction <add>, %21, %cst_14 [1] : vector<16x32xf32> to vector<16xf32>
    %23 = vector.shape_cast %22 : vector<16xf32> to vector<16x1xf32>
    %cst_15 = arith.constant 3.125000e-02 : f32
    %24 = vector.broadcast %cst_15 : f32 to vector<16x1xf32>
    %25 = arith.mulf %20, %24 : vector<16x1xf32>
    %cst_16 = arith.constant 3.125000e-02 : f32
    %26 = vector.broadcast %cst_16 : f32 to vector<16x1xf32>
    %27 = arith.mulf %23, %26 : vector<16x1xf32>
    %28 = arith.mulf %25, %25 : vector<16x1xf32>
    %29 = arith.subf %27, %28 : vector<16x1xf32>
    %cst_17 = arith.constant 0.000000e+00 : f32
    %30 = vector.broadcast %cst_17 : f32 to vector<16x1xf32>
    %31 = arith.maximumf %29, %30 : vector<16x1xf32>
    %32 = vector.broadcast %25 : vector<16x1xf32> to vector<16x32xf32>
    %33 = arith.subf %18, %32 : vector<16x32xf32>
    %cst_18 = arith.constant 9.99999996E-13 : f32
    %34 = vector.broadcast %cst_18 : f32 to vector<16x1xf32>
    %35 = arith.addf %31, %34 : vector<16x1xf32>
    %36 = math.rsqrt %35 : vector<16x1xf32>
    %37 = vector.broadcast %36 : vector<16x1xf32> to vector<16x32xf32>
    %38 = arith.mulf %33, %37 : vector<16x32xf32>
    %39 = vector.extract_strided_slice %12 {offsets = [1, 0], sizes = [1, 32], strides = [1, 1]} : vector<3x32xf32> to vector<1x32xf32>
    %40 = vector.broadcast %39 : vector<1x32xf32> to vector<16x32xf32>
    %41 = arith.mulf %38, %40 : vector<16x32xf32>
    %42 = vector.extract_strided_slice %12 {offsets = [2, 0], sizes = [1, 32], strides = [1, 1]} : vector<3x32xf32> to vector<1x32xf32>
    %43 = vector.broadcast %42 : vector<1x32xf32> to vector<16x32xf32>
    %44 = arith.addf %41, %43 : vector<16x32xf32>
    %45 = arith.truncf %44 : vector<16x32xf32> to vector<16x32xbf16>
    %c1 = arith.constant 1 : index
    %c0_19 = arith.constant 0 : index
    %c0_20 = arith.constant 0 : index
    %46 = vector.load %arg4[%c1, %c0_19, %c0_20] : memref<2x32x32xbf16, #tpu.memory_space<vmem>>, vector<1x32x32xbf16>
    %47 = vector.shape_cast %46 : vector<1x32x32xbf16> to vector<32x32xbf16>
    %cst_21 = arith.constant dense<0.000000e+00> : vector<16x32xf32>
    %48 = tpu.matmul %45, %47, %cst_21 {dimension_numbers = #tpu.dot_dimension_numbers<[1], [0], [0], [1], [0, 0, 1, 1], [], []>} : vector<16x32xbf16>, vector<32x32xbf16>, vector<16x32xf32> -> vector<16x32xf32>
    %c1_22 = arith.constant 1 : index
    %c0_23 = arith.constant 0 : index
    %c0_24 = arith.constant 0 : index
    %49 = vector.load %arg5[%c1_22, %c0_23, %c0_24] : memref<2x3x32xf32, #tpu.memory_space<vmem>>, vector<1x3x32xf32>
    %50 = vector.shape_cast %49 : vector<1x3x32xf32> to vector<3x32xf32>
    %51 = vector.extract_strided_slice %50 {offsets = [0, 0], sizes = [1, 32], strides = [1, 1]} : vector<3x32xf32> to vector<1x32xf32>
    %52 = vector.broadcast %51 : vector<1x32xf32> to vector<16x32xf32>
    %53 = arith.addf %48, %52 : vector<16x32xf32>
    %cst_25 = arith.constant 0.000000e+00 : f32
    %54 = vector.broadcast %cst_25 : f32 to vector<16x32xf32>
    %55 = arith.maximumf %53, %54 : vector<16x32xf32>
    %56 = arith.addf %55, %44 : vector<16x32xf32>
    %cst_26 = arith.constant dense<0.000000e+00> : vector<16xf32>
    %57 = vector.multi_reduction <add>, %56, %cst_26 [1] : vector<16x32xf32> to vector<16xf32>
    %58 = vector.shape_cast %57 : vector<16xf32> to vector<16x1xf32>
    %59 = arith.mulf %56, %56 : vector<16x32xf32>
    %cst_27 = arith.constant dense<0.000000e+00> : vector<16xf32>
    %60 = vector.multi_reduction <add>, %59, %cst_27 [1] : vector<16x32xf32> to vector<16xf32>
    %61 = vector.shape_cast %60 : vector<16xf32> to vector<16x1xf32>
    %cst_28 = arith.constant 3.125000e-02 : f32
    %62 = vector.broadcast %cst_28 : f32 to vector<16x1xf32>
    %63 = arith.mulf %58, %62 : vector<16x1xf32>
    %cst_29 = arith.constant 3.125000e-02 : f32
    %64 = vector.broadcast %cst_29 : f32 to vector<16x1xf32>
    %65 = arith.mulf %61, %64 : vector<16x1xf32>
    %66 = arith.mulf %63, %63 : vector<16x1xf32>
    %67 = arith.subf %65, %66 : vector<16x1xf32>
    %cst_30 = arith.constant 0.000000e+00 : f32
    %68 = vector.broadcast %cst_30 : f32 to vector<16x1xf32>
    %69 = arith.maximumf %67, %68 : vector<16x1xf32>
    %70 = vector.broadcast %63 : vector<16x1xf32> to vector<16x32xf32>
    %71 = arith.subf %56, %70 : vector<16x32xf32>
    %cst_31 = arith.constant 9.99999996E-13 : f32
    %72 = vector.broadcast %cst_31 : f32 to vector<16x1xf32>
    %73 = arith.addf %69, %72 : vector<16x1xf32>
    %74 = math.rsqrt %73 : vector<16x1xf32>
    %75 = vector.broadcast %74 : vector<16x1xf32> to vector<16x32xf32>
    %76 = arith.mulf %71, %75 : vector<16x32xf32>
    %77 = vector.extract_strided_slice %50 {offsets = [1, 0], sizes = [1, 32], strides = [1, 1]} : vector<3x32xf32> to vector<1x32xf32>
    %78 = vector.broadcast %77 : vector<1x32xf32> to vector<16x32xf32>
    %79 = arith.mulf %76, %78 : vector<16x32xf32>
    %80 = vector.extract_strided_slice %50 {offsets = [2, 0], sizes = [1, 32], strides = [1, 1]} : vector<3x32xf32> to vector<1x32xf32>
    %81 = vector.broadcast %80 : vector<1x32xf32> to vector<16x32xf32>
    %82 = arith.addf %79, %81 : vector<16x32xf32>
    %83 = arith.truncf %82 : vector<16x32xf32> to vector<16x32xbf16>
    %c0_32 = arith.constant 0 : index
    %c0_33 = arith.constant 0 : index
    %84 = vector.load %arg6[%c0_32, %c0_33] : memref<32x128xbf16, #tpu.memory_space<vmem>>, vector<32x128xbf16>
    %cst_34 = arith.constant dense<0.000000e+00> : vector<16x128xf32>
    %85 = tpu.matmul %83, %84, %cst_34 {dimension_numbers = #tpu.dot_dimension_numbers<[1], [0], [0], [1], [0, 0, 1, 1], [], []>} : vector<16x32xbf16>, vector<32x128xbf16>, vector<16x128xf32> -> vector<16x128xf32>
    %c0_35 = arith.constant 0 : index
    %c0_36 = arith.constant 0 : index
    %86 = vector.load %arg7[%c0_35, %c0_36] : memref<1x128xf32, #tpu.memory_space<vmem>>, vector<1x128xf32>
    %87 = vector.broadcast %86 : vector<1x128xf32> to vector<16x128xf32>
    %88 = arith.addf %85, %87 : vector<16x128xf32>
    %89 = arith.truncf %88 : vector<16x128xf32> to vector<16x128xbf16>
    %c0_37 = arith.constant 0 : index
    %c0_38 = arith.constant 0 : index
    %90 = vector.load %arg8[%c0_37, %c0_38] : memref<16x128xbf16, #tpu.memory_space<vmem>>, vector<16x128xbf16>
    tpu.vector_store %arg8[%c0_37, %c0_38], %89 {strides = array<i32>} : memref<16x128xbf16, #tpu.memory_space<vmem>>, vector<16x128xbf16>,
    return
  }
  func.func @transform_0(%arg0: i32) -> (i32, i32) {
    %c0_i32 = arith.constant 0 : i32
    %c0_i32_0 = arith.constant 0 : i32
    return %arg0, %c0_i32 : i32, i32
  }
  func.func @transform_1(%arg0: i32) -> (i32, i32) {
    %c0_i32 = arith.constant 0 : i32
    %c0_i32_0 = arith.constant 0 : i32
    %c0_i32_1 = arith.constant 0 : i32
    return %c0_i32, %c0_i32_0 : i32, i32
  }
  func.func @transform_2(%arg0: i32) -> (i32, i32) {
    %c0_i32 = arith.constant 0 : i32
    %c0_i32_0 = arith.constant 0 : i32
    %c0_i32_1 = arith.constant 0 : i32
    return %c0_i32, %c0_i32_0 : i32, i32
  }
  func.func @transform_3(%arg0: i32) -> (i32, i32, i32) {
    %c0_i32 = arith.constant 0 : i32
    %c0_i32_0 = arith.constant 0 : i32
    %c0_i32_1 = arith.constant 0 : i32
    %c0_i32_2 = arith.constant 0 : i32
    return %c0_i32, %c0_i32_0, %c0_i32_1 : i32, i32, i32
  }
  func.func @transform_4(%arg0: i32) -> (i32, i32, i32) {
    %c0_i32 = arith.constant 0 : i32
    %c0_i32_0 = arith.constant 0 : i32
    %c0_i32_1 = arith.constant 0 : i32
    %c0_i32_2 = arith.constant 0 : i32
    return %c0_i32, %c0_i32_0, %c0_i32_1 : i32, i32, i32
  }
  func.func @transform_5(%arg0: i32) -> (i32, i32) {
    %c0_i32 = arith.constant 0 : i32
    %c0_i32_0 = arith.constant 0 : i32
    %c0_i32_1 = arith.constant 0 : i32
    return %c0_i32, %c0_i32_0 : i32, i32
  }
  func.func @transform_6(%arg0: i32) -> (i32, i32) {
    %c0_i32 = arith.constant 0 : i32
    %c0_i32_0 = arith.constant 0 : i32
    %c0_i32_1 = arith.constant 0 : i32
    return %c0_i32, %c0_i32_0 : i32, i32
  }
  func.func @transform_7(%arg0: i32) -> (i32, i32) {
    %c0_i32 = arith.constant 0 : i32
    %c0_i32_0 = arith.constant 0 : i32
    return %arg0, %c0_i32 : i32, i32
  }
}

</mosaic_0001>

<bundles_post_ra>
// kernel: tpu_custom_call.1
= control target key start
LH: loop header
LB: loop body
LE: loop exit
PB: predicated region body
PF: predicated region fallthrough
CT: control target
= control target key end

     0   :  { %12 = vsyncpa [#allocation3], 0  ;;  %s757_s0 = inlined_call_operand.hbm [shape: f32[16,16], index: 0, kind: input, shape index: {}]   ;;  %s758_s1 = inlined_call_operand.vmem [shape: bf16[16,32], index: 1, kind: input, shape index: {}]   ;;  %s759_s2 = inlined_call_operand.vmem [shape: f32[1,32], index: 2, kind: input, shape index: {}]   ;;  %s760_s3 = inlined_call_operand.hbm [shape: bf16[2,32,32], index: 3, kind: input, shape index: {}]   ;;  %s761_s4 = inlined_call_operand.vmem [shape: f32[2,3,32], index: 4, kind: input, shape index: {}]   ;;  %s762_s5 = inlined_call_operand.vmem [shape: bf16[32,128], index: 5, kind: input, shape index: {}]   ;;  %s763_s6 = inlined_call_operand.vmem [shape: f32[1,128], index: 6, kind: input, shape index: {}]   ;;  %s764_s7 = inlined_call_operand.hbm [shape: bf16[16,128], index: 7, kind: output, shape index: {}]  }
   0x1   :  { %13 = vsyncpa [#allocation6], 0 }
   0x2   :  { %14 = vsyncpa [#allocation4], 0  ;;  %s606_s24 = smov [#allocation2]   ;;  %s534_s28 = scalar_lea.hbm %s757_s0, 256 }
   0x3   :  { %s20_s25 = sshll.u32 %s606_s24, 4  ;;  %p535_p0 = scmp.ne.s32.totalorder %s757_s0, %s534_s28  ;;  %s21_s25 = int_to_ptr.vmem [resolvable:$true] %s20_s25 }
   0x4   :  { %p538_p1 = scmp.lt.u32.totalorder %s534_s28, %s757_s0 }
   0x6   :  { %p540_p2 = pnand %p538_p1, %p535_p0 }
   0x8   :  { %543 = shalt.err (!%p540_p2)
}
   0x9   :  { %s544_s10 = scalar_lea.vmem %s21_s25, 256  ;;  %p549_p4 = scmp.lt.s32.totalorder %s21_s25, %s21_s25 }
   0xa   :  { %p545_p3 = scmp.ne.s32.totalorder %s21_s25, %s544_s10  ;;  %p550_p5 = scmp.lt.s32.totalorder %s544_s10, %s544_s10 }
   0xc   :  { %p551_p6 = por %p550_p5, %p549_p4 }
   0xe   :  { %p552_p7 = pnand %p551_p6, %p545_p3 }
  0x10   :  { %555 = shalt.err (!%p552_p7)
}
  0x11   :  { %s607_s11 = smov 128   ;;  %s608_s12 = smov 8  }
  0x12   :  { %26 = dma.hbm_to_vmem [thread:$0]  %s757_s0, 256, %s21_s25, [#allocation3], %s607_s11, %s607_s11, %s608_s12  }
  0x13   :  { %s609_s15 = smov [#allocation5]   ;;  %s556_s19 = scalar_lea.hbm %s760_s3, 512 }
  0x14   :  { %s36_s16 = sshll.u32 %s609_s15, 4  ;;  %p557_p8 = scmp.ne.s32.totalorder %s760_s3, %s556_s19  ;;  %s37_s16 = int_to_ptr.vmem [resolvable:$true] %s36_s16 }
  0x15   :  { %p560_p9 = scmp.lt.u32.totalorder %s556_s19, %s760_s3 }
  0x17   :  { %p562_p10 = pnand %p560_p9, %p557_p8 }
  0x19   :  { %565 = shalt.err (!%p562_p10)
}
  0x1a   :  { %s566_s24 = scalar_lea.vmem %s37_s16, 512  ;;  %p571_p12 = scmp.lt.s32.totalorder %s37_s16, %s37_s16 }
  0x1b   :  { %p567_p11 = scmp.ne.s32.totalorder %s37_s16, %s566_s24  ;;  %p572_p13 = scmp.lt.s32.totalorder %s566_s24, %s566_s24 }
  0x1d   :  { %p573_p0 = por %p572_p13, %p571_p12 }
  0x1f   :  { %p574_p1 = pnand %p573_p0, %p567_p11 }
  0x21   :  { %577 = shalt.err (!%p574_p1)
}
  0x22   :  { %s610_s0 = smov 64   ;;  %s611_s25 = smov 4  }
  0x23   :  { %42 = dma.hbm_to_vmem [thread:$0]  %s760_s3, 512, %s37_s16, [#allocation6], %s610_s0, %s610_s0, %s611_s25  }
  0x24   :  { %600 = dma.done.wait [#allocation3], 256  }
  0x25   :  { %601 = vsyncadd [#allocation3], 4294967040 }
  0x26   :  { %602 = dma.done.wait [#allocation6], 512  }
  0x27   :  { %603 = vsyncadd [#allocation6], 4294966784  ;;  %v612_v0 = vmov 0.0   ;;  %vm613_vm0 = vmmov 0   ;;  %v519_v1 = vld [vmem:[%s758_s1] sm:$0xff]   ;;  %v57_v3 = vld [vmem:[#allocation2 + $0x8] sm:$0xff]  ;;  %v125_v15 = vlaneseq }
  0x28   :  { %480 = vmatprep.subr.bf16.mxu0 %v612_v0  ;;  %482 = vmatprep.mubr.msk.bf16.mxu0 %vm613_vm0, %v612_v0  ;;  %v56_v2 = vld [vmem:[#allocation2] sm:$0xff]  ;;  %vm74_vm1 = vcmask 130048   ;;  %v520_v5 = vld [vmem:[#allocation5] sm:$0xff]   ;;  %v521_v6 = vld [vmem:[#allocation5 + $0x8] sm:$0xff]   ;;  %vm141_vm2 = vcmask 261120   ;;  %s614_s14 = smov [#allocation7]  }
  0x29   :  { %486 = vmatprep.subr.bf16.mxu1 %v612_v0  ;;  %490 = vmatprep.mubr.msk.bf16.mxu1 %vm613_vm0, %v612_v0  ;;  %v58_v4 = vpack.c.bf16 %v57_v3, %v56_v2  ;;  %v446_v7 = vld [vmem:[%s759_s2] ss:$0 sm:$0xff]  ;;  %v702_v16 = vshrl.u32 %v125_v15, 7  ;;  %v523_v37 = vld [vmem:[#allocation5 + $0x18] sm:$0xff]   ;;  %s433_s15 = sshll.u32 %s614_s14, 4  ;;  %s434_s15 = int_to_ptr.vmem [resolvable:$true] %s433_s15 }
  0x2a   :  { %481 = vmatpush3.bf16.msra.mxu0 %v519_v1  ;;  %487 = vmatpush3.bf16.msra.mxu1 %v520_v5  ;;  %v124_v18 = vld [vmem:[%s761_s4] sm:$0x7]  ;;  %s578_s16 = scalar_lea.vmem %s434_s15, 128  ;;  %p583_p3 = scmp.lt.s32.totalorder %s434_s15, %s434_s15 }
  0x2b   :  { %494 = vmatprep.subr.bf16.mxu0 %v612_v0  ;;  %488 = vmatprep.subr.bf16.mxu1 %v612_v0  ;;  %v127_v17 = vsub.s32 0, %v702_v16  ;;  %v522_v36 = vld [vmem:[#allocation5 + $0x10] sm:$0xff]   ;;  %v224_v54 = vsub.s32 1, %v702_v16  ;;  %v230_v58 = vsub.s32 2, %v702_v16  ;;  %p579_p2 = scmp.ne.s32.totalorder %s434_s15, %s578_s16  ;;  %p584_p4 = scmp.lt.s32.totalorder %s578_s16, %s578_s16 }
  0x2d   :  { %483 = vmatmul.mubr.msk.bf16.vlgmr.msra.gmra.mrb[0].mxu0 %vm74_vm1, %v58_v4  ;;  %v128_v19 = vrot.slane %v124_v18, %v127_v17  ;;  %v225_v57 = vrot.slane %v124_v18, %v224_v54  ;;  %v231_v62 = vrot.slane %v124_v18, %v230_v58  ;;  %p585_p5 = por %p584_p4, %p583_p3 }
  0x2e   :  { %498 = vmatprep.mubr.msk.bf16.mxu0 %vm613_vm0, %v612_v0  ;;  %489 = vmatpush3.bf16.msra.mxu1 %v521_v6  ;;  %v452_v6 = vld [vmem:[%s761_s4 + $0x4] sm:$0x7] }
  0x2f   :  { %502 = vmatprep.subr.bf16.mxu1 %v612_v0  ;;  %495 = vmatpush3.bf16.msra.mxu0 %v522_v36  ;;  %p586_p6 = pnand %p585_p5, %p579_p2 }
  0x30   :  { %496 = vmatprep.subr.bf16.mxu0 %v612_v0 }
  0x33   :  { %497 = vmatpush3.bf16.msra.mxu0 %v523_v37 }
 0x100   :  { %v112_v8 = vpop.f32.mrb[0].mxu0 }
 0x101   :  { %v484_v9 = vpop.f32.mrb[1].mxu0  ;;  %v113_v11 = vadd.f32 %v446_v7, %v112_v8 }
 0x102   :  { %v115_v10 = vpop.f32.mrb[2].mxu0 }
 0x103   :  { %v116_v12 = vadd.f32 %v446_v7, %v115_v10  ;;  %v485_v13 = vpop.f32.mrb[3].mxu0  ;;  %v245_v7 = vrot.slane %v452_v6, %v127_v17 }
 0x105   :  { %v119_v14 = vpack.c.bf16 %v116_v12, %v113_v11 }
 0x107   :  { %491 = vmatmul.mubr.msk.bf16.vlgmr.msra.gmra.mrb[0].mxu1 %vm141_vm2, %v119_v14 }
 0x108   :  { %506 = vmatprep.mubr.msk.bf16.mxu1 %vm613_vm0, %v612_v0 }
 0x1da   :  { %v179_v20 = vpop.f32.mrb[0].mxu1 }
 0x1db   :  { %v180_v21 = vadd.f32 %v179_v20, %v128_v19  ;;  %v492_v22 = vpop.f32.mrb[1].mxu1 }
 0x1dc   :  { %v182_v23 = vpop.f32.mrb[2].mxu1 }
 0x1dd   :  { %v186_v24 = vmax.f32 %v180_v21, 0.0  ;;  %v183_v25 = vadd.f32 %v182_v23, %v128_v19  ;;  %v493_v26 = vpop.f32.mrb[3].mxu1 }
 0x1de   :  { %v525_v26 = vld [vmem:[%s762_s5 + $0x8] sm:$0xff]  }
 0x1df   :  { %v188_v27 = vadd.f32 %v186_v24, %v113_v11  ;;  %v187_v28 = vmax.f32 %v183_v25, 0.0  ;;  %v524_v25 = vld [vmem:[%s762_s5] sm:$0xff]  }
 0x1e0   :  { %503 = vmatpush3.bf16.msra.mxu1 %v524_v25 }
 0x1e1   :  { %v189_v29 = vadd.f32 %v187_v28, %v116_v12  ;;  %v190_v30 = vsel %vm141_vm2, %v188_v27, 0.0  ;;  %v196_v31 = vmul.f32 %v188_v27, %v188_v27  ;;  %504 = vmatprep.subr.bf16.mxu1 %v612_v0  ;;  %v341_v0 = vrot.slane %v452_v6, %v224_v54  ;;  %v456_v54 = vld [vmem:[%s763_s6] ss:$0 sm:$0xff] }
 0x1e2   :  { %191 = vadd.xlane.f32.xlu0 %v190_v30 }
 0x1e3   :  { %v198_v32 = vsel %vm141_vm2, %v196_v31, 0.0  ;;  %v197_v33 = vmul.f32 %v189_v29, %v189_v29  ;;  %v193_v34 = vsel %vm141_vm2, %v189_v29, 0.0 }
 0x1e4   :  { %199 = vadd.xlane.f32.xlu1 %v198_v32  ;;  %505 = vmatpush3.bf16.msra.mxu1 %v525_v26 }
 0x1e5   :  { %v201_v35 = vsel %vm141_vm2, %v197_v33, 0.0 }
 0x1e6   :  { %194 = vadd.xlane.f32.xlu0 %v193_v34 }
 0x1e8   :  { %202 = vadd.xlane.f32.xlu1 %v201_v35 }
 0x26f   :  { %v192_v38 = vpop.xlane.xlu0 %191 }
 0x270   :  { %v204_v39 = vmul.f32 0.03125, %v192_v38 }
 0x271   :  { %v200_v40 = vpop.xlane.xlu1 %199 }
 0x272   :  { %v208_v41 = vmul.f32 %v204_v39, %v204_v39  ;;  %v206_v42 = vmul.f32 0.03125, %v200_v40  ;;  %v214_v55 = vsub.f32 %v188_v27, %v204_v39 }
 0x273   :  { %v195_v43 = vpop.xlane.xlu0 %194 }
 0x274   :  { %v210_v44 = vsub.f32 %v206_v42, %v208_v41  ;;  %v205_v45 = vmul.f32 0.03125, %v195_v43 }
 0x275   :  { %v203_v46 = vpop.xlane.xlu1 %202 }
 0x276   :  { %v212_v47 = vmax.f32 %v210_v44, 0.0  ;;  %v209_v48 = vmul.f32 %v205_v45, %v205_v45  ;;  %v207_v49 = vmul.f32 0.03125, %v203_v46  ;;  %v215_v60 = vsub.f32 %v189_v29, %v205_v45 }
 0x278   :  { %v216_v50 = vadd.f32 1e-12, %v212_v47  ;;  %v211_v51 = vsub.f32 %v207_v49, %v209_v48  ;;  %v347_v48 = vrot.slane %v452_v6, %v230_v58 }
 0x27a   :  { %526 = vrsqrt.f32 %v216_v50  ;;  %v213_v52 = vmax.f32 %v211_v51, 0.0 }
 0x27c   :  { %v217_v53 = vadd.f32 1e-12, %v213_v52 }
 0x27e   :  { %528 = vrsqrt.f32 %v217_v53 }
 0x284   :  { %v527_v56 = vpop.eup %526 }
 0x285   :  { %v220_v59 = vmul.f32 %v527_v56, %v214_v55 }
 0x287   :  { %v226_v1 = vmul.f32 %v225_v57, %v220_v59 }
 0x288   :  { %v529_v61 = vpop.eup %528 }
 0x289   :  { %v221_v63 = vmul.f32 %v529_v61, %v215_v60  ;;  %v232_v3 = vadd.f32 %v231_v62, %v226_v1 }
 0x28b   :  { %v227_v2 = vmul.f32 %v225_v57, %v221_v63 }
 0x28d   :  { %v233_v4 = vadd.f32 %v231_v62, %v227_v2 }
 0x28f   :  { %v234_v5 = vpack.c.bf16 %v233_v4, %v232_v3 }
 0x291   :  { %499 = vmatmul.mubr.msk.bf16.vlgmr.msra.gmra.mrb[4].mxu0 %vm141_vm2, %v234_v5 }
 0x364   :  { %v295_v8 = vpop.f32.mrb[4].mxu0 }
 0x365   :  { %v296_v9 = vadd.f32 %v295_v8, %v245_v7  ;;  %v500_v10 = vpop.f32.mrb[5].mxu0 }
 0x366   :  { %v298_v11 = vpop.f32.mrb[6].mxu0 }
 0x367   :  { %v302_v12 = vmax.f32 %v296_v9, 0.0  ;;  %v299_v13 = vadd.f32 %v298_v11, %v245_v7  ;;  %v501_v14 = vpop.f32.mrb[7].mxu0 }
 0x369   :  { %v304_v15 = vadd.f32 %v302_v12, %v232_v3  ;;  %v303_v18 = vmax.f32 %v299_v13, 0.0 }
 0x36b   :  { %v305_v19 = vadd.f32 %v303_v18, %v233_v4  ;;  %v306_v20 = vsel %vm141_vm2, %v304_v15, 0.0  ;;  %v312_v21 = vmul.f32 %v304_v15, %v304_v15 }
 0x36c   :  { %307 = vadd.xlane.f32.xlu0 %v306_v20 }
 0x36d   :  { %v309_v22 = vsel %vm141_vm2, %v305_v19, 0.0  ;;  %v313_v23 = vmul.f32 %v305_v19, %v305_v19  ;;  %v314_v17 = vsel %vm141_vm2, %v312_v21, 0.0 }
 0x36e   :  { %310 = vadd.xlane.f32.xlu1 %v309_v22 }
 0x36f   :  { %v317_v24 = vsel %vm141_vm2, %v313_v23, 0.0 }
 0x370   :  { %315 = vadd.xlane.f32.xlu0 %v314_v17 }
 0x372   :  { %318 = vadd.xlane.f32.xlu1 %v317_v24 }
 0x3f9   :  { %v308_v27 = vpop.xlane.xlu0 %307 }
 0x3fa   :  { %v320_v28 = vmul.f32 0.03125, %v308_v27 }
 0x3fb   :  { %v311_v29 = vpop.xlane.xlu1 %310 }
 0x3fc   :  { %v321_v30 = vmul.f32 0.03125, %v311_v29  ;;  %v324_v32 = vmul.f32 %v320_v28, %v320_v28  ;;  %v330_v43 = vsub.f32 %v304_v15, %v320_v28 }
 0x3fd   :  { %v316_v31 = vpop.xlane.xlu0 %315 }
 0x3fe   :  { %v322_v33 = vmul.f32 0.03125, %v316_v31  ;;  %v325_v35 = vmul.f32 %v321_v30, %v321_v30  ;;  %v331_v45 = vsub.f32 %v305_v19, %v321_v30 }
 0x3ff   :  { %v319_v34 = vpop.xlane.xlu1 %318 }
 0x400   :  { %v326_v36 = vsub.f32 %v322_v33, %v324_v32  ;;  %v323_v37 = vmul.f32 0.03125, %v319_v34 }
 0x402   :  { %v328_v38 = vmax.f32 %v326_v36, 0.0  ;;  %v327_v39 = vsub.f32 %v323_v37, %v325_v35 }
 0x404   :  { %v332_v40 = vadd.f32 1e-12, %v328_v38  ;;  %v329_v41 = vmax.f32 %v327_v39, 0.0 }
 0x406   :  { %530 = vrsqrt.f32 %v332_v40  ;;  %v333_v42 = vadd.f32 1e-12, %v329_v41 }
 0x408   :  { %532 = vrsqrt.f32 %v333_v42 }
 0x410   :  { %v531_v44 = vpop.eup %530 }
 0x411   :  { %v336_v46 = vmul.f32 %v531_v44, %v330_v43 }
 0x412   :  { %v533_v47 = vpop.eup %532 }
 0x413   :  { %v337_v49 = vmul.f32 %v533_v47, %v331_v45  ;;  %v342_v50 = vmul.f32 %v341_v0, %v336_v46 }
 0x415   :  { %v343_v51 = vmul.f32 %v341_v0, %v337_v49  ;;  %v348_v52 = vadd.f32 %v347_v48, %v342_v50 }
 0x417   :  { %v349_v53 = vadd.f32 %v347_v48, %v343_v51 }
 0x419   :  { %v350_v55 = vpack.c.bf16 %v349_v53, %v348_v52 }
 0x41b   :  { %507 = vmatmul.mubr.msk.bf16.vlgmr.msra.gmra.mrb[4].mxu1 %vm141_vm2, %v350_v55 }
 0x4ee   :  { %v411_v56 = vpop.f32.mrb[4].mxu1 }
 0x4ef   :  { %v508_v57 = vpop.f32.mrb[5].mxu1  ;;  %v412_v60 = vadd.f32 %v456_v54, %v411_v56 }
 0x4f0   :  { %v414_v59 = vpop.f32.mrb[6].mxu1 }
 0x4f1   :  { %v415_v16 = vadd.f32 %v456_v54, %v414_v59  ;;  %v509_v58 = vpop.f32.mrb[7].mxu1 }
 0x4f3   :  { %v467_v61 = vpack.c.bf16 %v415_v16, %v412_v60 }
 0x4f5   :  { %468 = vst [vmem:[#allocation7] sm:$0xff] %v467_v61  }
 0x4f6   :  { %589 = shalt.err (!%p586_p6)
}
 0x4f7   :  { %s590_s18 = scalar_lea.hbm %s764_s7, 128 }
 0x4f8   :  { %p591_p7 = scmp.ne.s32.totalorder %s764_s7, %s590_s18  ;;  %p594_p8 = scmp.lt.u32.totalorder %s590_s18, %s764_s7 }
 0x4fa   :  { %p596_p9 = pnand %p594_p8, %p591_p7 }
 0x4fc   :  { %599 = shalt.err (!%p596_p9)
}
 0x4fd   :  { %439 = dma.vmem_to_hbm [thread:$0]  %s434_s15, 128, %s764_s7, [#allocation4], %s610_s0, %s610_s0, %s611_s25  }
 0x4fe   :  { %604 = dma.done.wait [#allocation4], 128  }
 0x4ff   :  { %605 = vsyncadd [#allocation4], 4294967168 }
 0x500   :  { %443 = vsyncpa [#allocation3], 1 }
 0x501   :  { %444 = vsyncpa [#allocation6], 1 }
 0x502   :  { %445 = vsyncpa [#allocation4], 1 }

// kernel: tpu_custom_call.1
= control target key start
LH: loop header
LB: loop body
LE: loop exit
PB: predicated region body
PF: predicated region fallthrough
CT: control target
= control target key end

     0   :  { %12 = vsyncpa [#allocation3], 0  ;;  %s757_s0 = inlined_call_operand.hbm [shape: f32[16,16], index: 0, kind: input, shape index: {}]   ;;  %s758_s1 = inlined_call_operand.vmem [shape: bf16[16,32], index: 1, kind: input, shape index: {}]   ;;  %s759_s2 = inlined_call_operand.vmem [shape: f32[1,32], index: 2, kind: input, shape index: {}]   ;;  %s760_s3 = inlined_call_operand.hbm [shape: bf16[2,32,32], index: 3, kind: input, shape index: {}]   ;;  %s761_s4 = inlined_call_operand.vmem [shape: f32[2,3,32], index: 4, kind: input, shape index: {}]   ;;  %s762_s5 = inlined_call_operand.vmem [shape: bf16[32,128], index: 5, kind: input, shape index: {}]   ;;  %s763_s6 = inlined_call_operand.vmem [shape: f32[1,128], index: 6, kind: input, shape index: {}]   ;;  %s764_s7 = inlined_call_operand.hbm [shape: bf16[16,128], index: 7, kind: output, shape index: {}]  }
   0x1   :  { %13 = vsyncpa [#allocation6], 0 }
   0x2   :  { %14 = vsyncpa [#allocation4], 0  ;;  %s606_s24 = smov [#allocation2]   ;;  %s534_s28 = scalar_lea.hbm %s757_s0, 256 }
   0x3   :  { %s20_s25 = sshll.u32 %s606_s24, 4  ;;  %p535_p0 = scmp.ne.s32.totalorder %s757_s0, %s534_s28  ;;  %s21_s25 = int_to_ptr.vmem [resolvable:$true] %s20_s25 }
   0x4   :  { %p538_p1 = scmp.lt.u32.totalorder %s534_s28, %s757_s0 }
   0x6   :  { %p540_p2 = pnand %p538_p1, %p535_p0 }
   0x8   :  { %543 = shalt.err (!%p540_p2)
}
   0x9   :  { %s544_s10 = scalar_lea.vmem %s21_s25, 256  ;;  %p549_p4 = scmp.lt.s32.totalorder %s21_s25, %s21_s25 }
   0xa   :  { %p545_p3 = scmp.ne.s32.totalorder %s21_s25, %s544_s10  ;;  %p550_p5 = scmp.lt.s32.totalorder %s544_s10, %s544_s10 }
   0xc   :  { %p551_p6 = por %p550_p5, %p549_p4 }
   0xe   :  { %p552_p7 = pnand %p551_p6, %p545_p3 }
  0x10   :  { %555 = shalt.err (!%p552_p7)
}
  0x11   :  { %s607_s11 = smov 128   ;;  %s608_s12 = smov 8  }
  0x12   :  { %26 = dma.hbm_to_vmem [thread:$0]  %s757_s0, 256, %s21_s25, [#allocation3], %s607_s11, %s607_s11, %s608_s12  }
  0x13   :  { %s609_s15 = smov [#allocation5]   ;;  %s556_s19 = scalar_lea.hbm %s760_s3, 512 }
  0x14   :  { %s36_s16 = sshll.u32 %s609_s15, 4  ;;  %p557_p8 = scmp.ne.s32.totalorder %s760_s3, %s556_s19  ;;  %s37_s16 = int_to_ptr.vmem [resolvable:$true] %s36_s16 }
  0x15   :  { %p560_p9 = scmp.lt.u32.totalorder %s556_s19, %s760_s3 }
  0x17   :  { %p562_p10 = pnand %p560_p9, %p557_p8 }
  0x19   :  { %565 = shalt.err (!%p562_p10)
}
  0x1a   :  { %s566_s24 = scalar_lea.vmem %s37_s16, 512  ;;  %p571_p12 = scmp.lt.s32.totalorder %s37_s16, %s37_s16 }
  0x1b   :  { %p567_p11 = scmp.ne.s32.totalorder %s37_s16, %s566_s24  ;;  %p572_p13 = scmp.lt.s32.totalorder %s566_s24, %s566_s24 }
  0x1d   :  { %p573_p0 = por %p572_p13, %p571_p12 }
  0x1f   :  { %p574_p1 = pnand %p573_p0, %p567_p11 }
  0x21   :  { %577 = shalt.err (!%p574_p1)
}
  0x22   :  { %s610_s0 = smov 64   ;;  %s611_s25 = smov 4  }
  0x23   :  { %42 = dma.hbm_to_vmem [thread:$0]  %s760_s3, 512, %s37_s16, [#allocation6], %s610_s0, %s610_s0, %s611_s25  }
  0x24   :  { %600 = dma.done.wait [#allocation3], 256  }
  0x25   :  { %601 = vsyncadd [#allocation3], 4294967040 }
  0x26   :  { %602 = dma.done.wait [#allocation6], 512  }
  0x27   :  { %603 = vsyncadd [#allocation6], 4294966784  ;;  %v612_v0 = vmov 0.0   ;;  %vm613_vm0 = vmmov 0   ;;  %v519_v1 = vld [vmem:[%s758_s1] sm:$0xff]   ;;  %v57_v3 = vld [vmem:[#allocation2 + $0x8] sm:$0xff]  ;;  %v125_v15 = vlaneseq }
  0x28   :  { %480 = vmatprep.subr.bf16.mxu0 %v612_v0  ;;  %482 = vmatprep.mubr.msk.bf16.mxu0 %vm613_vm0, %v612_v0  ;;  %v56_v2 = vld [vmem:[#allocation2] sm:$0xff]  ;;  %vm74_vm1 = vcmask 130048   ;;  %v520_v5 = vld [vmem:[#allocation5] sm:$0xff]   ;;  %v521_v6 = vld [vmem:[#allocation5 + $0x8] sm:$0xff]   ;;  %vm141_vm2 = vcmask 261120   ;;  %s614_s14 = smov [#allocation7]  }
  0x29   :  { %486 = vmatprep.subr.bf16.mxu1 %v612_v0  ;;  %490 = vmatprep.mubr.msk.bf16.mxu1 %vm613_vm0, %v612_v0  ;;  %v58_v4 = vpack.c.bf16 %v57_v3, %v56_v2  ;;  %v446_v7 = vld [vmem:[%s759_s2] ss:$0 sm:$0xff]  ;;  %v702_v16 = vshrl.u32 %v125_v15, 7  ;;  %v523_v37 = vld [vmem:[#allocation5 + $0x18] sm:$0xff]   ;;  %s433_s15 = sshll.u32 %s614_s14, 4  ;;  %s434_s15 = int_to_ptr.vmem [resolvable:$true] %s433_s15 }
  0x2a   :  { %481 = vmatpush3.bf16.msra.mxu0 %v519_v1  ;;  %487 = vmatpush3.bf16.msra.mxu1 %v520_v5  ;;  %v124_v18 = vld [vmem:[%s761_s4] sm:$0x7]  ;;  %s578_s16 = scalar_lea.vmem %s434_s15, 128  ;;  %p583_p3 = scmp.lt.s32.totalorder %s434_s15, %s434_s15 }
  0x2b   :  { %494 = vmatprep.subr.bf16.mxu0 %v612_v0  ;;  %488 = vmatprep.subr.bf16.mxu1 %v612_v0  ;;  %v127_v17 = vsub.s32 0, %v702_v16  ;;  %v522_v36 = vld [vmem:[#allocation5 + $0x10] sm:$0xff]   ;;  %v224_v54 = vsub.s32 1, %v702_v16  ;;  %v230_v58 = vsub.s32 2, %v702_v16  ;;  %p579_p2 = scmp.ne.s32.totalorder %s434_s15, %s578_s16  ;;  %p584_p4 = scmp.lt.s32.totalorder %s578_s16, %s578_s16 }
  0x2d   :  { %483 = vmatmul.mubr.msk.bf16.vlgmr.msra.gmra.mrb[0].mxu0 %vm74_vm1, %v58_v4  ;;  %v128_v19 = vrot.slane %v124_v18, %v127_v17  ;;  %v225_v57 = vrot.slane %v124_v18, %v224_v54  ;;  %v231_v62 = vrot.slane %v124_v18, %v230_v58  ;;  %p585_p5 = por %p584_p4, %p583_p3 }
  0x2e   :  { %498 = vmatprep.mubr.msk.bf16.mxu0 %vm613_vm0, %v612_v0  ;;  %489 = vmatpush3.bf16.msra.mxu1 %v521_v6  ;;  %v452_v6 = vld [vmem:[%s761_s4 + $0x4] sm:$0x7] }
  0x2f   :  { %502 = vmatprep.subr.bf16.mxu1 %v612_v0  ;;  %495 = vmatpush3.bf16.msra.mxu0 %v522_v36  ;;  %p586_p6 = pnand %p585_p5, %p579_p2 }
  0x30   :  { %496 = vmatprep.subr.bf16.mxu0 %v612_v0 }
  0x33   :  { %497 = vmatpush3.bf16.msra.mxu0 %v523_v37 }
 0x100   :  { %v112_v8 = vpop.f32.mrb[0].mxu0 }
 0x101   :  { %v484_v9 = vpop.f32.mrb[1].mxu0  ;;  %v113_v11 = vadd.f32 %v446_v7, %v112_v8 }
 0x102   :  { %v115_v10 = vpop.f32.mrb[2].mxu0 }
 0x103   :  { %v116_v12 = vadd.f32 %v446_v7, %v115_v10  ;;  %v485_v13 = vpop.f32.mrb[3].mxu0  ;;  %v245_v7 = vrot.slane %v452_v6, %v127_v17 }
 0x105   :  { %v119_v14 = vpack.c.bf16 %v116_v12, %v113_v11 }
 0x107   :  { %491 = vmatmul.mubr.msk.bf16.vlgmr.msra.gmra.mrb[0].mxu1 %vm141_vm2, %v119_v14 }
 0x108   :  { %506 = vmatprep.mubr.msk.bf16.mxu1 %vm613_vm0, %v612_v0 }
 0x1da   :  { %v179_v20 = vpop.f32.mrb[0].mxu1 }
 0x1db   :  { %v180_v21 = vadd.f32 %v179_v20, %v128_v19  ;;  %v492_v22 = vpop.f32.mrb[1].mxu1 }
 0x1dc   :  { %v182_v23 = vpop.f32.mrb[2].mxu1 }
 0x1dd   :  { %v186_v24 = vmax.f32 %v180_v21, 0.0  ;;  %v183_v25 = vadd.f32 %v182_v23, %v128_v19  ;;  %v493_v26 = vpop.f32.mrb[3].mxu1 }
 0x1de   :  { %v525_v26 = vld [vmem:[%s762_s5 + $0x8] sm:$0xff]  }
 0x1df   :  { %v188_v27 = vadd.f32 %v186_v24, %v113_v11  ;;  %v187_v28 = vmax.f32 %v183_v25, 0.0  ;;  %v524_v25 = vld [vmem:[%s762_s5] sm:$0xff]  }
 0x1e0   :  { %503 = vmatpush3.bf16.msra.mxu1 %v524_v25 }
 0x1e1   :  { %v189_v29 = vadd.f32 %v187_v28, %v116_v12  ;;  %v190_v30 = vsel %vm141_vm2, %v188_v27, 0.0  ;;  %v196_v31 = vmul.f32 %v188_v27, %v188_v27  ;;  %504 = vmatprep.subr.bf16.mxu1 %v612_v0  ;;  %v341_v0 = vrot.slane %v452_v6, %v224_v54  ;;  %v456_v54 = vld [vmem:[%s763_s6] ss:$0 sm:$0xff] }
 0x1e2   :  { %191 = vadd.xlane.f32.xlu0 %v190_v30 }
 0x1e3   :  { %v198_v32 = vsel %vm141_vm2, %v196_v31, 0.0  ;;  %v197_v33 = vmul.f32 %v189_v29, %v189_v29  ;;  %v193_v34 = vsel %vm141_vm2, %v189_v29, 0.0 }
 0x1e4   :  { %199 = vadd.xlane.f32.xlu1 %v198_v32  ;;  %505 = vmatpush3.bf16.msra.mxu1 %v525_v26 }
 0x1e5   :  { %v201_v35 = vsel %vm141_vm2, %v197_v33, 0.0 }
 0x1e6   :  { %194 = vadd.xlane.f32.xlu0 %v193_v34 }
 0x1e8   :  { %202 = vadd.xlane.f32.xlu1 %v201_v35 }
 0x26f   :  { %v192_v38 = vpop.xlane.xlu0 %191 }
 0x270   :  { %v204_v39 = vmul.f32 0.03125, %v192_v38 }
 0x271   :  { %v200_v40 = vpop.xlane.xlu1 %199 }
 0x272   :  { %v208_v41 = vmul.f32 %v204_v39, %v204_v39  ;;  %v206_v42 = vmul.f32 0.03125, %v200_v40  ;;  %v214_v55 = vsub.f32 %v188_v27, %v204_v39 }
 0x273   :  { %v195_v43 = vpop.xlane.xlu0 %194 }
 0x274   :  { %v210_v44 = vsub.f32 %v206_v42, %v208_v41  ;;  %v205_v45 = vmul.f32 0.03125, %v195_v43 }
 0x275   :  { %v203_v46 = vpop.xlane.xlu1 %202 }
 0x276   :  { %v212_v47 = vmax.f32 %v210_v44, 0.0  ;;  %v209_v48 = vmul.f32 %v205_v45, %v205_v45  ;;  %v207_v49 = vmul.f32 0.03125, %v203_v46  ;;  %v215_v60 = vsub.f32 %v189_v29, %v205_v45 }
 0x278   :  { %v216_v50 = vadd.f32 1e-12, %v212_v47  ;;  %v211_v51 = vsub.f32 %v207_v49, %v209_v48  ;;  %v347_v48 = vrot.slane %v452_v6, %v230_v58 }
 0x27a   :  { %526 = vrsqrt.f32 %v216_v50  ;;  %v213_v52 = vmax.f32 %v211_v51, 0.0 }
 0x27c   :  { %v217_v53 = vadd.f32 1e-12, %v213_v52 }
 0x27e   :  { %528 = vrsqrt.f32 %v217_v53 }
 0x284   :  { %v527_v56 = vpop.eup %526 }
 0x285   :  { %v220_v59 = vmul.f32 %v527_v56, %v214_v55 }
 0x287   :  { %v226_v1 = vmul.f32 %v225_v57, %v220_v59 }
 0x288   :  { %v529_v61 = vpop.eup %528 }
 0x289   :  { %v221_v63 = vmul.f32 %v529_v61, %v215_v60  ;;  %v232_v3 = vadd.f32 %v231_v62, %v226_v1 }
 0x28b   :  { %v227_v2 = vmul.f32 %v225_v57, %v221_v63 }
 0x28d   :  { %v233_v4 = vadd.f32 %v231_v62, %v227_v2 }
 0x28f   :  { %v234_v5 = vpack.c.bf16 %v233_v4, %v232_v3 }
 0x291   :  { %499 = vmatmul.mubr.msk.bf16.vlgmr.msra.gmra.mrb[4].mxu0 %vm141_vm2, %v234_v5 }
 0x364   :  { %v295_v8 = vpop.f32.mrb[4].mxu0 }
 0x365   :  { %v296_v9 = vadd.f32 %v295_v8, %v245_v7  ;;  %v500_v10 = vpop.f32.mrb[5].mxu0 }
 0x366   :  { %v298_v11 = vpop.f32.mrb[6].mxu0 }
 0x367   :  { %v302_v12 = vmax.f32 %v296_v9, 0.0  ;;  %v299_v13 = vadd.f32 %v298_v11, %v245_v7  ;;  %v501_v14 = vpop.f32.mrb[7].mxu0 }
 0x369   :  { %v304_v15 = vadd.f32 %v302_v12, %v232_v3  ;;  %v303_v18 = vmax.f32 %v299_v13, 0.0 }
 0x36b   :  { %v305_v19 = vadd.f32 %v303_v18, %v233_v4  ;;  %v306_v20 = vsel %vm141_vm2, %v304_v15, 0.0  ;;  %v312_v21 = vmul.f32 %v304_v15, %v304_v15 }
 0x36c   :  { %307 = vadd.xlane.f32.xlu0 %v306_v20 }
 0x36d   :  { %v309_v22 = vsel %vm141_vm2, %v305_v19, 0.0  ;;  %v313_v23 = vmul.f32 %v305_v19, %v305_v19  ;;  %v314_v17 = vsel %vm141_vm2, %v312_v21, 0.0 }
 0x36e   :  { %310 = vadd.xlane.f32.xlu1 %v309_v22 }
 0x36f   :  { %v317_v24 = vsel %vm141_vm2, %v313_v23, 0.0 }
 0x370   :  { %315 = vadd.xlane.f32.xlu0 %v314_v17 }
 0x372   :  { %318 = vadd.xlane.f32.xlu1 %v317_v24 }
 0x3f9   :  { %v308_v27 = vpop.xlane.xlu0 %307 }
 0x3fa   :  { %v320_v28 = vmul.f32 0.03125, %v308_v27 }
 0x3fb   :  { %v311_v29 = vpop.xlane.xlu1 %310 }
 0x3fc   :  { %v321_v30 = vmul.f32 0.03125, %v311_v29  ;;  %v324_v32 = vmul.f32 %v320_v28, %v320_v28  ;;  %v330_v43 = vsub.f32 %v304_v15, %v320_v28 }
 0x3fd   :  { %v316_v31 = vpop.xlane.xlu0 %315 }
 0x3fe   :  { %v322_v33 = vmul.f32 0.03125, %v316_v31  ;;  %v325_v35 = vmul.f32 %v321_v30, %v321_v30  ;;  %v331_v45 = vsub.f32 %v305_v19, %v321_v30 }
 0x3ff   :  { %v319_v34 = vpop.xlane.xlu1 %318 }
 0x400   :  { %v326_v36 = vsub.f32 %v322_v33, %v324_v32  ;;  %v323_v37 = vmul.f32 0.03125, %v319_v34 }
 0x402   :  { %v328_v38 = vmax.f32 %v326_v36, 0.0  ;;  %v327_v39 = vsub.f32 %v323_v37, %v325_v35 }
 0x404   :  { %v332_v40 = vadd.f32 1e-12, %v328_v38  ;;  %v329_v41 = vmax.f32 %v327_v39, 0.0 }
 0x406   :  { %530 = vrsqrt.f32 %v332_v40  ;;  %v333_v42 = vadd.f32 1e-12, %v329_v41 }
 0x408   :  { %532 = vrsqrt.f32 %v333_v42 }
 0x410   :  { %v531_v44 = vpop.eup %530 }
 0x411   :  { %v336_v46 = vmul.f32 %v531_v44, %v330_v43 }
 0x412   :  { %v533_v47 = vpop.eup %532 }
 0x413   :  { %v337_v49 = vmul.f32 %v533_v47, %v331_v45  ;;  %v342_v50 = vmul.f32 %v341_v0, %v336_v46 }
 0x415   :  { %v343_v51 = vmul.f32 %v341_v0, %v337_v49  ;;  %v348_v52 = vadd.f32 %v347_v48, %v342_v50 }
 0x417   :  { %v349_v53 = vadd.f32 %v347_v48, %v343_v51 }
 0x419   :  { %v350_v55 = vpack.c.bf16 %v349_v53, %v348_v52 }
 0x41b   :  { %507 = vmatmul.mubr.msk.bf16.vlgmr.msra.gmra.mrb[4].mxu1 %vm141_vm2, %v350_v55 }
 0x4ee   :  { %v411_v56 = vpop.f32.mrb[4].mxu1 }
 0x4ef   :  { %v508_v57 = vpop.f32.mrb[5].mxu1  ;;  %v412_v60 = vadd.f32 %v456_v54, %v411_v56 }
 0x4f0   :  { %v414_v59 = vpop.f32.mrb[6].mxu1 }
 0x4f1   :  { %v415_v16 = vadd.f32 %v456_v54, %v414_v59  ;;  %v509_v58 = vpop.f32.mrb[7].mxu1 }
 0x4f3   :  { %v467_v61 = vpack.c.bf16 %v415_v16, %v412_v60 }
 0x4f5   :  { %468 = vst [vmem:[#allocation7] sm:$0xff] %v467_v61  }
 0x4f6   :  { %589 = shalt.err (!%p586_p6)
}
 0x4f7   :  { %s590_s18 = scalar_lea.hbm %s764_s7, 128 }
 0x4f8   :  { %p591_p7 = scmp.ne.s32.totalorder %s764_s7, %s590_s18  ;;  %p594_p8 = scmp.lt.u32.totalorder %s590_s18, %s764_s7 }
 0x4fa   :  { %p596_p9 = pnand %p594_p8, %p591_p7 }
 0x4fc   :  { %599 = shalt.err (!%p596_p9)
}
 0x4fd   :  { %439 = dma.vmem_to_hbm [thread:$0]  %s434_s15, 128, %s764_s7, [#allocation4], %s610_s0, %s610_s0, %s611_s25  }
 0x4fe   :  { %604 = dma.done.wait [#allocation4], 128  }
 0x4ff   :  { %605 = vsyncadd [#allocation4], 4294967168 }
 0x500   :  { %443 = vsyncpa [#allocation3], 1 }
 0x501   :  { %444 = vsyncpa [#allocation6], 1 }
 0x502   :  { %445 = vsyncpa [#allocation4], 1 }

</bundles_post_ra>
